<compile_context>
chip_gen: v5e
topology: v5e:2x2
jax: 0.10.0
libtpu: 0.0.40
codegen_flags: <defaults>
</compile_context>

<pallas_src>
import functools

import jax
import jax.numpy as jnp
from jax.experimental import pallas as pl
from jax.experimental.pallas import tpu as pltpu


def _round_up(x: int, m: int) -> int:
    return ((x + m - 1) // m) * m


def _device_kind() -> str:
    try:
        return jax.devices()[0].device_kind.lower()
    except Exception:  # pragma: no cover - defensive; default to generic path
        return ""


def _choose_tk(H: int, tk_target: int, tk_override=None) -> int:
    """Hidden-dim tile: full H unless it exceeds tk_target, then a 128-multiple divisor."""
    if tk_override is not None:
        if H % tk_override == 0 and (tk_override % 128 == 0 or tk_override == H):
            return tk_override
    if H <= tk_target:
        return H
    n = 2
    while n * 128 <= H:
        if H % n == 0:
            tk = H // n
            if tk <= tk_target and tk % 128 == 0:
                return tk
        n += 1
    return H  # no clean 128-multiple divisor: fall back to full H (TM shrinks instead)


def _choose_chunk(tk: int) -> int:
    """In-kernel reduction chunk: bounded, lane-aligned divisor of the K tile."""
    for c in (512, 384, 256, 128):
        if tk % c == 0:
            return c
    return tk  # small / odd hidden sizes: single full-width chunk


def _value_head_kernel(x_ref, w_ref, b_ref, o_ref, acc_ref, *, chunk, n_chunks):
    # x_ref:   [TM, TK] activation tile (bf16/f32), VMEM (streamed)
    # w_ref:   [1, TK]  lane-dense f32 weight slab, VMEM
    # b_ref:   [1, 1]   f32 bias scalar, SMEM
    # o_ref:   [TM, 1]  f32 output tile, VMEM (resident across the K axis)
    # acc_ref: [TM, 1]  f32 scratch accumulator
    k = pl.program_id(1)

    @pl.when(k == 0)
    def _init():
        acc_ref[...] = jnp.zeros_like(acc_ref)

    # Chunked multiply-accumulate along the hidden (lane) dim: the f32 temporary
    # is bounded at [TM, chunk] (<= 512 lanes) instead of [TM, TK].  n_chunks is
    # a Python int, so this statically unrolls (== lax.fori_loop(unroll=True))
    # with zero-cost static slices of the VMEM refs.
    part = None
    for c in range(n_chunks):
        lo = c * chunk
        xc = x_ref[:, lo:lo + chunk].astype(jnp.float32)   # per-vreg upcast fused into the mul
        wc = w_ref[:, lo:lo + chunk]                        # [1, chunk], sublane-broadcast
        prod = xc * wc                                      # VPU
        part = prod if part is None else part + prod
    acc_ref[...] += jnp.sum(part, axis=-1, keepdims=True)   # single XLU cross-lane reduce

    @pl.when(k == pl.num_programs(1) - 1)
    def _finalize():
        o_ref[...] = acc_ref[...] + b_ref[0, 0]


def value_head_forward(hidden_states, weight, bias, *, tm=None, tk=None):
    """ValueHead (layer_type='linear') forward, eval mode.

    hidden_states: [B, S, H]; weight: [1, H] (PyTorch nn.Linear layout); bias: [1].
    Returns [B, S, 1] float32, matching x.to(weight.dtype) @ W^T + b.
    `tm` / `tk` optionally override the auto-derived row / hidden tile sizes.
    """
    B, S, H = hidden_states.shape
    M = B * S
    itemsize = jnp.dtype(hidden_states.dtype).itemsize

    is_v7x = "v7" in _device_kind()

    tm_target = tm if tm is not None else (2048 if is_v7x else 1024)
    tk_target = 8192 if is_v7x else 16384          # split hidden dim only past this
    n_xbuf = 3 if is_v7x else 2                    # Buffered(3) on v7x, default 2 elsewhere

    TK = _choose_tk(H, tk_target, tk)
    n_k = H // TK
    chunk = _choose_chunk(TK)
    n_chunks = TK // chunk

    # VMEM budget: n_xbuf activation buffers + ~2 chunk-wide f32 temps + out/acc,
    # kept well under the 48 MiB scoped limit (and v7x's 64 MiB physical VMEM).
    vmem_limit = 48 * 1024 * 1024
    budget = 36 * 1024 * 1024
    per_row = n_xbuf * TK * itemsize + 2 * 4 * chunk + 2 * 4 + 4
    tm_budget = max(8, budget // per_row)
    TM = min(tm_target, tm_budget, _round_up(M, 8))
    TM = max(8, (TM // 8) * 8)                     # sublane multiple

    x2d = hidden_states.reshape(M, H)              # layout no-op; no padding copy
    w_row = weight.astype(jnp.float32).reshape(1, H)
    b2d = bias.astype(jnp.float32).reshape(1, 1)

    grid = (pl.cdiv(M, TM), n_k)                   # ragged last row block handled by Pallas

    x_spec_kwargs = dict(block_shape=(TM, TK), index_map=lambda i, k: (i, k))
    if is_v7x:
        # Deeper pipelining to amortize the fixed per-grid-step cost vs v7x's ~3.2 TB/s HBM.
        x_spec_kwargs["pipeline_mode"] = pl.Buffered(3)
    x_spec = pl.BlockSpec(**x_spec_kwargs)

    # Row axis: shard across v7x's two TensorCores (CORE_PARALLEL changes codegen;
    # plain "parallel" is a near no-op).  Single-TC v5e/v6e keep PARALLEL.
    dim_sem = (pltpu.CORE_PARALLEL if is_v7x else pltpu.PARALLEL, pltpu.ARBITRARY)

    kernel = functools.partial(_value_head_kernel, chunk=chunk, n_chunks=n_chunks)

    out2d = pl.pallas_call(
        kernel,
        out_shape=jax.ShapeDtypeStruct((M, 1), jnp.float32),
        grid=grid,
        in_specs=[
            x_spec,                                                  # streamed activations
            pl.BlockSpec((1, TK), lambda i, k: (0, k)),              # lane-dense weight slab
            pl.BlockSpec(memory_space=pltpu.MemorySpace.SMEM),       # bias scalar
        ],
        out_specs=pl.BlockSpec((TM, 1), lambda i, k: (i, 0)),        # resident across k
        scratch_shapes=[pltpu.VMEM((TM, 1), jnp.float32)],           # f32 accumulator
        compiler_params=pltpu.CompilerParams(
            dimension_semantics=dim_sem,
            vmem_limit_bytes=vmem_limit,   # explicit: v5e's scoped default is only 16 MiB
        ),
    )(x2d, w_row, b2d)

    return out2d.reshape(B, S, 1)


def _reference(hidden_states, weight, bias):
    """Eval-mode ValueHead in plain JAX (elementwise, avoids matmul-precision noise)."""
    H = hidden_states.shape[-1]
    x = hidden_states.astype(jnp.float32)
    w = weight.astype(jnp.float32).reshape(1, 1, H)
    return (x * w).sum(-1, keepdims=True) + bias.astype(jnp.float32)


def _make_inputs(key, B, S, H):
    k_x, k_w, k_b = jax.random.split(key, 3)
    hs = jax.random.normal(k_x, (B, S, H), dtype=jnp.bfloat16)   # GPT2-like bf16 activations
    bound = 1.0 / (H ** 0.5)                                     # PyTorch nn.Linear default init
    w = jax.random.uniform(k_w, (1, H), minval=-bound, maxval=bound, dtype=jnp.float32)
    b = jax.random.uniform(k_b, (1,), minval=-bound, maxval=bound, dtype=jnp.float32)
    return hs, w, b


if __name__ == "__main__":
    # 1) Small GPT2-like shape (single row tile, single K block, single chunk).
    hs, w, b = _make_inputs(jax.random.PRNGKey(0), 2, 8, 32)
    out = jax.block_until_ready(value_head_forward(hs, w, b))
    assert out.shape == (2, 8, 1)
    assert jnp.allclose(out, _reference(hs, w, b), atol=2e-4, rtol=1e-4)

    # 2) Ragged row tail (M=26, TM=16 -> masked last block) + multi-chunk reduction.
    hs, w, b = _make_inputs(jax.random.PRNGKey(1), 2, 13, 640)
    out = jax.block_until_ready(value_head_forward(hs, w, b, tm=16))
    assert out.shape == (2, 13, 1)
    assert jnp.allclose(out, _reference(hs, w, b), atol=2e-4, rtol=1e-4)

    # 3) Hidden (K) grid axis with scratch accumulator (n_k=5) + ragged rows.
    out = jax.block_until_ready(value_head_forward(hs, w, b, tm=16, tk=128))
    assert out.shape == (2, 13, 1)
    assert jnp.allclose(out, _reference(hs, w, b), atol=2e-4, rtol=1e-4)

    print("KERNEL_OK")
</pallas_src>

<mosaic_0001>
module attributes {stable_mosaic.version = 11 : i64} {
  func.func @_value_head_kernel(%arg0: i32, %arg1: i32, %arg2: memref<16x32xbf16, #tpu.memory_space<vmem>>, %arg3: memref<1x32xf32, #tpu.memory_space<vmem>>, %arg4: memref<1x1xf32, #tpu.memory_space<smem>>, %arg5: memref<16x1xf32, #tpu.memory_space<vmem>>, %arg6: memref<16x1xf32, #tpu.memory_space<vmem>>) attributes {dimension_semantics = [#tpu.dimension_semantics<parallel>, #tpu.dimension_semantics<arbitrary>], iteration_bounds = array<i64: 1, 1>, scalar_prefetch = 0 : i64, scratch_operands = 1 : i64, tpu.core_type = #tpu.core_type<tc>, window_params = [{transform_indices = @transform_0, window_bounds = array<i64: 16, 32>}, {transform_indices = @transform_1, window_bounds = array<i64: 1, 32>}, {transform_indices = @transform_2, window_bounds = array<i64: 1, 1>}, {transform_indices = @transform_3, window_bounds = array<i64: 16, 1>}]} {
    %c0_i32 = arith.constant 0 : i32
    %0 = arith.cmpi eq, %arg1, %c0_i32 : i32
    %1 = arith.extui %0 : i1 to i32
    %c0_i32_0 = arith.constant 0 : i32
    %2 = arith.cmpi ne, %1, %c0_i32_0 : i32
    scf.if %2 {
      %cst_10 = arith.constant 0.000000e+00 : f32
      %16 = vector.broadcast %cst_10 : f32 to vector<16x1xf32>
      %c0_11 = arith.constant 0 : index
      %c0_12 = arith.constant 0 : index
      %17 = vector.load %arg6[%c0_11, %c0_12] : memref<16x1xf32, #tpu.memory_space<vmem>>, vector<16x1xf32>
      tpu.vector_store %arg6[%c0_11, %c0_12], %16 {strides = array<i32>} : memref<16x1xf32, #tpu.memory_space<vmem>>, vector<16x1xf32>,
    } else {
    }
    %c0 = arith.constant 0 : index
    %c0_1 = arith.constant 0 : index
    %3 = vector.load %arg2[%c0, %c0_1] : memref<16x32xbf16, #tpu.memory_space<vmem>>, vector<16x32xbf16>
    %4 = arith.extf %3 : vector<16x32xbf16> to vector<16x32xf32>
    %c0_2 = arith.constant 0 : index
    %c0_3 = arith.constant 0 : index
    %5 = vector.load %arg3[%c0_2, %c0_3] : memref<1x32xf32, #tpu.memory_space<vmem>>, vector<1x32xf32>
    %6 = vector.broadcast %5 : vector<1x32xf32> to vector<16x32xf32>
    %7 = arith.mulf %4, %6 : vector<16x32xf32>
    %c0_4 = arith.constant 0 : index
    %c0_5 = arith.constant 0 : index
    %8 = vector.load %arg6[%c0_4, %c0_5] : memref<16x1xf32, #tpu.memory_space<vmem>>, vector<16x1xf32>
    %cst = arith.constant dense<0.000000e+00> : vector<16xf32>
    %9 = vector.multi_reduction <add>, %7, %cst [1] : vector<16x32xf32> to vector<16xf32>
    %10 = vector.shape_cast %9 : vector<16xf32> to vector<16x1xf32>
    %11 = arith.addf %8, %10 : vector<16x1xf32>
    %c0_6 = arith.constant 0 : index
    %c0_7 = arith.constant 0 : index
    %12 = vector.load %arg6[%c0_6, %c0_7] : memref<16x1xf32, #tpu.memory_space<vmem>>, vector<16x1xf32>
    tpu.vector_store %arg6[%c0_6, %c0_7], %11 {strides = array<i32>} : memref<16x1xf32, #tpu.memory_space<vmem>>, vector<16x1xf32>,
    %c0_i32_8 = arith.constant 0 : i32
    %13 = arith.cmpi eq, %arg1, %c0_i32_8 : i32
    %14 = arith.extui %13 : i1 to i32
    %c0_i32_9 = arith.constant 0 : i32
    %15 = arith.cmpi ne, %14, %c0_i32_9 : i32
    scf.if %15 {
      %c0_10 = arith.constant 0 : index
      %c0_11 = arith.constant 0 : index
      %16 = vector.load %arg6[%c0_10, %c0_11] : memref<16x1xf32, #tpu.memory_space<vmem>>, vector<16x1xf32>
      %c0_12 = arith.constant 0 : index
      %c0_13 = arith.constant 0 : index
      %17 = memref.load %arg4[%c0_12, %c0_13] : memref<1x1xf32, #tpu.memory_space<smem>>
      %18 = vector.broadcast %17 : f32 to vector<16x1xf32>
      %19 = arith.addf %16, %18 : vector<16x1xf32>
      %c0_14 = arith.constant 0 : index
      %c0_15 = arith.constant 0 : index
      %20 = vector.load %arg5[%c0_14, %c0_15] : memref<16x1xf32, #tpu.memory_space<vmem>>, vector<16x1xf32>
      tpu.vector_store %arg5[%c0_14, %c0_15], %19 {strides = array<i32>} : memref<16x1xf32, #tpu.memory_space<vmem>>, vector<16x1xf32>,
    } else {
    }
    return
  }
  func.func @transform_0(%arg0: i32, %arg1: i32) -> (i32, i32) {
    %c0_i32 = arith.constant 0 : i32
    return %arg0, %arg1 : i32, i32
  }
  func.func @transform_1(%arg0: i32, %arg1: i32) -> (i32, i32) {
    %c0_i32 = arith.constant 0 : i32
    %c0_i32_0 = arith.constant 0 : i32
    return %c0_i32, %arg1 : i32, i32
  }
  func.func @transform_2(%arg0: i32, %arg1: i32) -> (i32, i32) {
    %c0_i32 = arith.constant 0 : i32
    %c0_i32_0 = arith.constant 0 : i32
    %c0_i32_1 = arith.constant 0 : i32
    return %c0_i32, %c0_i32_0 : i32, i32
  }
  func.func @transform_3(%arg0: i32, %arg1: i32) -> (i32, i32) {
    %c0_i32 = arith.constant 0 : i32
    %c0_i32_0 = arith.constant 0 : i32
    return %arg0, %c0_i32 : i32, i32
  }
}

</mosaic_0001>

<bundles_post_ra>
// kernel: tpu_custom_call.1
= control target key start
LH: loop header
LB: loop body
LE: loop exit
PB: predicated region body
PF: predicated region fallthrough
CT: control target
= control target key end

     0   :  { %9 = vsyncpa [#allocation5], 0  ;;  %s113_s15 = smov [#allocation4]   ;;  %s114_s17 = smov 64   ;;  %s158_s0 = inlined_call_operand.hbm [shape: bf16[16,32], index: 0, kind: input, shape index: {}]   ;;  %s159_s1 = inlined_call_operand.vmem [shape: f32[1,32], index: 1, kind: input, shape index: {}]   ;;  %s160_s2 = inlined_call_operand.<no memory space> [shape: f32[1,1], index: 2, kind: input, shape index: {}]   ;;  %s161_s3 = inlined_call_operand.vmem [shape: f32[16,1], index: 3, kind: output, shape index: {}]  }
   0x1   :  { %s14_s14 = sshll.u32 %s158_s0, 4  ;;  %s16_s16 = sshll.u32 %s113_s15, 4  ;;  %s15_s14 = int_to_ptr.hbm [resolvable:$true] %s14_s14  ;;  %s17_s16 = int_to_ptr.vmem [resolvable:$true] %s16_s16 }
   0x2   :  { %s115_s18 = smov 4  }
   0x3   :  { %22 = dma.hbm_to_vmem [thread:$0]  %s15_s14, 128, %s17_s16, [#allocation5], %s114_s17, %s114_s17, %s115_s18  }
   0x4   :  { %111 = dma.done.wait [#allocation5], 128  }
   0x5   :  { %112 = vsyncadd [#allocation5], 4294967168  ;;  %vm35_vm0 = vcmask 7168   ;;  %v116_v0 = vmov 0.0   ;;  %v79_v1 = vld [vmem:[#allocation4] sm:$0xff]   ;;  %vm50_vm1 = vcmask 261120   ;;  %v68_v13 = vstv %s160_s2 }
   0x6   :  { %36 = vst.msk [vmem:[#allocation2] sm:$0xff] %vm35_vm0, %v116_v0  ;;  %v86_v2 = vld [vmem:[%s159_s1] ss:$0 sm:$0xff]  ;;  %v80_v3 = vunpack.c.l.bf16 %v79_v1  ;;  %v81_v5 = vunpack.c.h.bf16 %v79_v1 }
   0x7   :  { %37 = vst.msk [vmem:[#allocation2 + $0x8] sm:$0xff] %vm35_vm0, %v116_v0 }
   0x8   :  { %v46_v4 = vmul.f32 %v86_v2, %v80_v3  ;;  %v47_v7 = vmul.f32 %v86_v2, %v81_v5 }
   0xa   :  { %v51_v6 = vsel %vm50_vm1, %v46_v4, 0.0  ;;  %v54_v8 = vsel %vm50_vm1, %v47_v7, 0.0 }
   0xb   :  { %52 = vadd.xlane.f32.xlu0 %v51_v6 }
   0xd   :  { %v48_v9 = vld [vmem:[#allocation2] sm:$0xff] }
   0xe   :  { %v49_v12 = vld [vmem:[#allocation2 + $0x8] sm:$0xff] }
  0x13   :  { %55 = vadd.xlane.f32.xlu0 %v54_v8 }
  0x7e   :  { %v53_v10 = vpop.xlane.xlu0 %52 }
  0x7f   :  { %v57_v11 = vadd.f32 %v53_v10, %v48_v9 }
  0x81   :  { %60 = vst.msk [vmem:[#allocation2] sm:$0xff] %vm35_vm0, %v57_v11 }
  0x86   :  { %v56_v14 = vpop.xlane.xlu0 %55 }
  0x87   :  { %v58_v15 = vadd.f32 %v56_v14, %v49_v12 }
  0x88   :  { %v65_v16 = vld [vmem:[#allocation2] sm:$0xff] }
  0x89   :  { %v69_v17 = vadd.f32 %v68_v13, %v65_v16  ;;  %61 = vst.msk [vmem:[#allocation2 + $0x8] sm:$0xff] %vm35_vm0, %v58_v15 }
  0x8b   :  { %71 = vst.msk [vmem:[%s161_s3] sm:$0xff] %vm35_vm0, %v69_v17 }
  0x90   :  { %v66_v18 = vld [vmem:[#allocation2 + $0x8] sm:$0xff] }
  0x91   :  { %v70_v19 = vadd.f32 %v68_v13, %v66_v18 }
  0x93   :  { %72 = vst.msk [vmem:[%s161_s3 + $0x8] sm:$0xff] %vm35_vm0, %v70_v19 }
  0x94   :  { %77 = vsyncpa [#allocation5], 1 }

</bundles_post_ra>
